<compile_context>
chip_gen: v7x
topology: tpu7x:2x2x1
jax: 0.10.0
libtpu: 0.0.40
codegen_flags: <defaults>
</compile_context>

<pallas_src>
import jax
import jax.numpy as jnp
from jax.experimental import pallas as pl
from jax.experimental.pallas import tpu as pltpu


NUM_CLASSES = 2      # classifier Linear(256, 2)
CLS_LANES = 128      # classifier output padded to a lane-dense 128-wide slab


# ---------------------------------------------------------------------------
# XLA glue: im2col for the 3x3 / stride-2 / pad-1 stem conv (fused by XLA)
# ---------------------------------------------------------------------------

def _im2col_3x3_s2(x_nchw):
    """Patches for 3x3/s2/p1 conv, K ordered (di, dj, c) -> (N*Ho*Wo, 9*C) bf16."""
    n, c, h, w = x_nchw.shape
    ho, wo = h // 2, w // 2
    xp = jnp.pad(x_nchw, ((0, 0), (0, 0), (1, 1), (1, 1)))
    pats = [xp[:, :, di:di + 2 * ho:2, dj:dj + 2 * wo:2]
            for di in range(3) for dj in range(3)]            # 9 x (N, C, Ho, Wo)
    patches = jnp.stack(pats, axis=1)                         # (N, 9, C, Ho, Wo)
    patches = patches.transpose(0, 3, 4, 1, 2)                # (N, Ho, Wo, 9, C)
    return patches.reshape(n * ho * wo, 9 * c).astype(jnp.bfloat16)


# ---------------------------------------------------------------------------
# Fused Pallas kernel: one grid step == one image, everything stays in VMEM
# ---------------------------------------------------------------------------

def _fused_kernel(p_ref, cw_ref, cb_ref, pw_ref, pb_ref,
                  fw_ref, fb_ref, kw_ref, kb_ref, o_ref):
    # ---- backbone stage 1: 3x3/s2 conv as matmul over patches + ReLU -------
    y = jnp.dot(p_ref[...], cw_ref[...], preferred_element_type=jnp.float32)
    y = jnp.maximum(y + cb_ref[...], 0.0)                      # (S, C1)  f32

    # ---- backbone stage 2: 1x1 conv -> num_infeature + ReLU ----------------
    z = jnp.dot(y.astype(jnp.bfloat16), pw_ref[...],
                preferred_element_type=jnp.float32)
    z = jnp.maximum(z + pb_ref[...], 0.0)                      # (S, F)   f32

    # ---- AdaptiveAvgPool2d(1) + squeeze ------------------------------------
    feat = jnp.mean(z, axis=0, keepdims=True)                  # (1, F)   f32

    # ---- fc(512, 256) -> ReLU -> Dropout (identity in eval) ----------------
    # TODO(synk): Dropout(0.5) is identity here (inference); a
    # pltpu.prng_random_bits mask would be needed for training parity.
    h = jnp.dot(feat.astype(jnp.bfloat16), fw_ref[...],
                preferred_element_type=jnp.float32)
    h = jnp.maximum(h + fb_ref[...], 0.0)                      # (1, 256) f32

    # ---- classifier Linear(256, 2) padded to 128 lanes + LogSoftmax --------
    logits = jnp.dot(h.astype(jnp.bfloat16), kw_ref[...],
                     preferred_element_type=jnp.float32) + kb_ref[...]  # (1,128)
    m = jnp.max(logits, axis=1, keepdims=True)
    lse = jnp.log(jnp.sum(jnp.exp(logits - m), axis=1, keepdims=True)) + m
    o_ref[0] = logits - lse                                    # lane-dense store


# ---------------------------------------------------------------------------
# Wrapper
# ---------------------------------------------------------------------------

def densenet_pre_net_forward(x_nchw, params):
    n, c, h, w = x_nchw.shape
    ho, wo = h // 2, w // 2
    s = ho * wo

    patches = _im2col_3x3_s2(x_nchw)                # (N*S, 9C) bf16, XLA glue

    cw, cb = params["conv_w"], params["conv_b"]
    pw, pb = params["pw_w"], params["pw_b"]
    fw, fb = params["fc_w"], params["fc_b"]
    kw, kb = params["cls_w"], params["cls_b"]
    c1, f, hid, lanes = cw.shape[1], pw.shape[1], fw.shape[1], kw.shape[1]

    flops = (2 * n * s * (9 * c) * c1 + 2 * n * s * c1 * f
             + 2 * n * f * hid + 2 * n * hid * lanes)
    bytes_accessed = int(
        patches.size * patches.dtype.itemsize
        + sum(int(v.size) * v.dtype.itemsize
              for v in (cw, cb, pw, pb, fw, fb, kw, kb))
        + n * lanes * 4)

    out = pl.pallas_call(
        _fused_kernel,
        out_shape=jax.ShapeDtypeStruct((n, 1, lanes), jnp.float32),
        grid=(n,),
        in_specs=[
            pl.BlockSpec((s, 9 * c), lambda i: (i, 0)),     # per-image patches
            pl.BlockSpec(cw.shape, lambda i: (0, 0)),
            pl.BlockSpec(cb.shape, lambda i: (0, 0)),
            pl.BlockSpec(pw.shape, lambda i: (0, 0)),
            pl.BlockSpec(pb.shape, lambda i: (0, 0)),
            pl.BlockSpec(fw.shape, lambda i: (0, 0)),
            pl.BlockSpec(fb.shape, lambda i: (0, 0)),
            pl.BlockSpec(kw.shape, lambda i: (0, 0)),
            pl.BlockSpec(kb.shape, lambda i: (0, 0)),
        ],
        out_specs=pl.BlockSpec((1, 1, lanes), lambda i: (i, 0, 0)),
        compiler_params=pltpu.CompilerParams(
            dimension_semantics=("parallel",)),
        cost_estimate=pl.CostEstimate(
            flops=flops,
            transcendentals=n * (lanes + 1),
            bytes_accessed=bytes_accessed),
    )(patches, cw, cb, pw, pb, fw, fb, kw, kb)

    return out.reshape(n, lanes)[:, :NUM_CLASSES]


def _reference_forward(x_nchw, params):
    """Pure-XLA reference with the same bf16-matmul / f32-accumulate policy."""
    n = x_nchw.shape[0]
    s = (x_nchw.shape[2] // 2) * (x_nchw.shape[3] // 2)
    p = _im2col_3x3_s2(x_nchw)
    y = jnp.maximum(jnp.dot(p, params["conv_w"],
                            preferred_element_type=jnp.float32)
                    + params["conv_b"], 0.0)
    z = jnp.maximum(jnp.dot(y.astype(jnp.bfloat16), params["pw_w"],
                            preferred_element_type=jnp.float32)
                    + params["pw_b"], 0.0)
    feat = jnp.mean(z.reshape(n, s, -1), axis=1)
    hid = jnp.maximum(jnp.dot(feat.astype(jnp.bfloat16), params["fc_w"],
                              preferred_element_type=jnp.float32)
                      + params["fc_b"], 0.0)
    logits = jnp.dot(hid.astype(jnp.bfloat16), params["cls_w"],
                     preferred_element_type=jnp.float32) + params["cls_b"]
    return jax.nn.log_softmax(logits, axis=1)[:, :NUM_CLASSES]


# ---------------------------------------------------------------------------
# Deterministic parameter init
# ---------------------------------------------------------------------------

def make_params(key, cin=4, c1=128, num_infeature=512, hidden=256,
                nclass=NUM_CLASSES, lanes=CLS_LANES):
    ks = jax.random.split(key, 8)
    conv_w = 0.10 * jax.random.normal(ks[0], (9 * cin, c1), jnp.float32)
    conv_b = 0.10 * jax.random.normal(ks[1], (1, c1), jnp.float32)
    pw_w = 0.05 * jax.random.normal(ks[2], (c1, num_infeature), jnp.float32)
    pw_b = 0.05 * jax.random.normal(ks[3], (1, num_infeature), jnp.float32)
    fc_w = 0.05 * jax.random.normal(ks[4], (num_infeature, hidden), jnp.float32)
    fc_b = 0.05 * jax.random.normal(ks[5], (1, hidden), jnp.float32)
    cls_w = 0.10 * jax.random.normal(ks[6], (hidden, nclass), jnp.float32)
    cls_b = 0.10 * jax.random.normal(ks[7], (1, nclass), jnp.float32)
    # Pad the classifier to a lane-dense 128-wide slab: zero weights and a
    # -1e30 bias on padded classes so they contribute exp(.) == 0 to LogSoftmax.
    cls_w_pad = jnp.zeros((hidden, lanes), jnp.float32).at[:, :nclass].set(cls_w)
    cls_b_pad = jnp.full((1, lanes), -1e30, jnp.float32).at[:, :nclass].set(cls_b)
    return {
        "conv_w": conv_w.astype(jnp.bfloat16), "conv_b": conv_b,
        "pw_w": pw_w.astype(jnp.bfloat16),     "pw_b": pw_b,
        "fc_w": fc_w.astype(jnp.bfloat16),     "fc_b": fc_b,
        "cls_w": cls_w_pad.astype(jnp.bfloat16), "cls_b": cls_b_pad,
    }


if __name__ == "__main__":
    key = jax.random.PRNGKey(0)
    kx, kp = jax.random.split(key)
    x = jax.random.normal(kx, (2, 4, 16, 16), jnp.float32)   # NCHW, like PyTorch
    params = make_params(kp)

    out = jax.block_until_ready(jax.jit(densenet_pre_net_forward)(x, params))
    ref = jax.block_until_ready(jax.jit(_reference_forward)(x, params))

    assert out.shape == (2, NUM_CLASSES)
    # LogSoftmax rows must exp-sum to 1
    assert jnp.allclose(jnp.sum(jnp.exp(out), axis=1), 1.0, atol=1e-4)
    # matches the pure-XLA reference (same bf16 matmul policy)
    assert jnp.allclose(out, ref, atol=2e-2, rtol=2e-2)
    print("KERNEL_OK")
</pallas_src>

<mosaic_0001>
module attributes {stable_mosaic.version = 11 : i64} {
  func.func @_fused_kernel(%arg0: i32, %arg1: memref<64x36xbf16, #tpu.memory_space<vmem>>, %arg2: memref<36x128xbf16, #tpu.memory_space<vmem>>, %arg3: memref<1x128xf32, #tpu.memory_space<vmem>>, %arg4: memref<128x512xbf16, #tpu.memory_space<vmem>>, %arg5: memref<1x512xf32, #tpu.memory_space<vmem>>, %arg6: memref<512x256xbf16, #tpu.memory_space<vmem>>, %arg7: memref<1x256xf32, #tpu.memory_space<vmem>>, %arg8: memref<256x128xbf16, #tpu.memory_space<vmem>>, %arg9: memref<1x128xf32, #tpu.memory_space<vmem>>, %arg10: memref<1x1x128xf32, #tpu.memory_space<vmem>>) attributes {dimension_semantics = [#tpu.dimension_semantics<parallel>], iteration_bounds = array<i64: 2>, scalar_prefetch = 0 : i64, scratch_operands = 0 : i64, tpu.core_type = #tpu.core_type<tc>, window_params = [{transform_indices = @transform_0, window_bounds = array<i64: 64, 36>}, {pipeline_mode = #tpu.pipeline_mode<synchronous>, transform_indices = @transform_1, window_bounds = array<i64: 36, 128>}, {pipeline_mode = #tpu.pipeline_mode<synchronous>, transform_indices = @transform_2, window_bounds = array<i64: 1, 128>}, {pipeline_mode = #tpu.pipeline_mode<synchronous>, transform_indices = @transform_3, window_bounds = array<i64: 128, 512>}, {pipeline_mode = #tpu.pipeline_mode<synchronous>, transform_indices = @transform_4, window_bounds = array<i64: 1, 512>}, {pipeline_mode = #tpu.pipeline_mode<synchronous>, transform_indices = @transform_5, window_bounds = array<i64: 512, 256>}, {pipeline_mode = #tpu.pipeline_mode<synchronous>, transform_indices = @transform_6, window_bounds = array<i64: 1, 256>}, {pipeline_mode = #tpu.pipeline_mode<synchronous>, transform_indices = @transform_7, window_bounds = array<i64: 256, 128>}, {pipeline_mode = #tpu.pipeline_mode<synchronous>, transform_indices = @transform_8, window_bounds = array<i64: 1, 128>}, {transform_indices = @transform_9, window_bounds = array<i64: 1, 1, 128>}]} {
    %c0 = arith.constant 0 : index
    %c0_0 = arith.constant 0 : index
    %0 = vector.load %arg1[%c0, %c0_0] : memref<64x36xbf16, #tpu.memory_space<vmem>>, vector<64x36xbf16>
    %c0_1 = arith.constant 0 : index
    %c0_2 = arith.constant 0 : index
    %1 = vector.load %arg2[%c0_1, %c0_2] : memref<36x128xbf16, #tpu.memory_space<vmem>>, vector<36x128xbf16>
    %cst = arith.constant dense<0.000000e+00> : vector<64x128xf32>
    %2 = tpu.matmul %0, %1, %cst {dimension_numbers = #tpu.dot_dimension_numbers<[1], [0], [0], [1], [0, 0, 1, 1], [], []>} : vector<64x36xbf16>, vector<36x128xbf16>, vector<64x128xf32> -> vector<64x128xf32>
    %c0_3 = arith.constant 0 : index
    %c0_4 = arith.constant 0 : index
    %3 = vector.load %arg3[%c0_3, %c0_4] : memref<1x128xf32, #tpu.memory_space<vmem>>, vector<1x128xf32>
    %4 = vector.broadcast %3 : vector<1x128xf32> to vector<64x128xf32>
    %5 = arith.addf %2, %4 : vector<64x128xf32>
    %cst_5 = arith.constant 0.000000e+00 : f32
    %6 = vector.broadcast %cst_5 : f32 to vector<64x128xf32>
    %7 = arith.maximumf %5, %6 : vector<64x128xf32>
    %8 = arith.truncf %7 : vector<64x128xf32> to vector<64x128xbf16>
    %c0_6 = arith.constant 0 : index
    %c0_7 = arith.constant 0 : index
    %9 = vector.load %arg4[%c0_6, %c0_7] : memref<128x512xbf16, #tpu.memory_space<vmem>>, vector<128x512xbf16>
    %cst_8 = arith.constant dense<0.000000e+00> : vector<64x512xf32>
    %10 = tpu.matmul %8, %9, %cst_8 {dimension_numbers = #tpu.dot_dimension_numbers<[1], [0], [0], [1], [0, 0, 1, 1], [], []>} : vector<64x128xbf16>, vector<128x512xbf16>, vector<64x512xf32> -> vector<64x512xf32>
    %c0_9 = arith.constant 0 : index
    %c0_10 = arith.constant 0 : index
    %11 = vector.load %arg5[%c0_9, %c0_10] : memref<1x512xf32, #tpu.memory_space<vmem>>, vector<1x512xf32>
    %12 = vector.broadcast %11 : vector<1x512xf32> to vector<64x512xf32>
    %13 = arith.addf %10, %12 : vector<64x512xf32>
    %cst_11 = arith.constant 0.000000e+00 : f32
    %14 = vector.broadcast %cst_11 : f32 to vector<64x512xf32>
    %15 = arith.maximumf %13, %14 : vector<64x512xf32>
    %cst_12 = arith.constant dense<0.000000e+00> : vector<512xf32>
    %16 = vector.multi_reduction <add>, %15, %cst_12 [0] : vector<64x512xf32> to vector<512xf32>
    %17 = vector.shape_cast %16 : vector<512xf32> to vector<1x512xf32>
    %cst_13 = arith.constant 6.400000e+01 : f32
    %18 = vector.broadcast %cst_13 : f32 to vector<1x512xf32>
    %19 = arith.divf %17, %18 : vector<1x512xf32>
    %20 = arith.truncf %19 : vector<1x512xf32> to vector<1x512xbf16>
    %c0_14 = arith.constant 0 : index
    %c0_15 = arith.constant 0 : index
    %21 = vector.load %arg6[%c0_14, %c0_15] : memref<512x256xbf16, #tpu.memory_space<vmem>>, vector<512x256xbf16>
    %cst_16 = arith.constant dense<0.000000e+00> : vector<1x256xf32>
    %22 = tpu.matmul %20, %21, %cst_16 {dimension_numbers = #tpu.dot_dimension_numbers<[1], [0], [0], [1], [0, 0, 1, 1], [], []>} : vector<1x512xbf16>, vector<512x256xbf16>, vector<1x256xf32> -> vector<1x256xf32>
    %c0_17 = arith.constant 0 : index
    %c0_18 = arith.constant 0 : index
    %23 = vector.load %arg7[%c0_17, %c0_18] : memref<1x256xf32, #tpu.memory_space<vmem>>, vector<1x256xf32>
    %24 = arith.addf %22, %23 : vector<1x256xf32>
    %cst_19 = arith.constant 0.000000e+00 : f32
    %25 = vector.broadcast %cst_19 : f32 to vector<1x256xf32>
    %26 = arith.maximumf %24, %25 : vector<1x256xf32>
    %27 = arith.truncf %26 : vector<1x256xf32> to vector<1x256xbf16>
    %c0_20 = arith.constant 0 : index
    %c0_21 = arith.constant 0 : index
    %28 = vector.load %arg8[%c0_20, %c0_21] : memref<256x128xbf16, #tpu.memory_space<vmem>>, vector<256x128xbf16>
    %cst_22 = arith.constant dense<0.000000e+00> : vector<1x128xf32>
    %29 = tpu.matmul %27, %28, %cst_22 {dimension_numbers = #tpu.dot_dimension_numbers<[1], [0], [0], [1], [0, 0, 1, 1], [], []>} : vector<1x256xbf16>, vector<256x128xbf16>, vector<1x128xf32> -> vector<1x128xf32>
    %c0_23 = arith.constant 0 : index
    %c0_24 = arith.constant 0 : index
    %30 = vector.load %arg9[%c0_23, %c0_24] : memref<1x128xf32, #tpu.memory_space<vmem>>, vector<1x128xf32>
    %31 = arith.addf %29, %30 : vector<1x128xf32>
    %cst_25 = arith.constant dense<0xFF800000> : vector<1xf32>
    %32 = vector.multi_reduction <maximumf>, %31, %cst_25 [1] : vector<1x128xf32> to vector<1xf32>
    %33 = vector.shape_cast %32 : vector<1xf32> to vector<1x1xf32>
    %34 = vector.broadcast %33 : vector<1x1xf32> to vector<1x128xf32>
    %35 = arith.subf %31, %34 : vector<1x128xf32>
    %36 = math.exp %35 : vector<1x128xf32>
    %cst_26 = arith.constant dense<0.000000e+00> : vector<1xf32>
    %37 = vector.multi_reduction <add>, %36, %cst_26 [1] : vector<1x128xf32> to vector<1xf32>
    %38 = vector.shape_cast %37 : vector<1xf32> to vector<1x1xf32>
    %39 = math.log %38 : vector<1x1xf32>
    %40 = arith.addf %39, %33 : vector<1x1xf32>
    %41 = vector.broadcast %40 : vector<1x1xf32> to vector<1x128xf32>
    %42 = arith.subf %31, %41 : vector<1x128xf32>
    %c0_27 = arith.constant 0 : index
    %c0_28 = arith.constant 0 : index
    %c0_29 = arith.constant 0 : index
    %43 = vector.load %arg10[%c0_27, %c0_28, %c0_29] : memref<1x1x128xf32, #tpu.memory_space<vmem>>, vector<1x1x128xf32>
    %44 = vector.shape_cast %43 : vector<1x1x128xf32> to vector<1x128xf32>
    %45 = vector.shape_cast %42 : vector<1x128xf32> to vector<1x1x128xf32>
    tpu.vector_store %arg10[%c0_27, %c0_28, %c0_29], %45 {strides = array<i32>} : memref<1x1x128xf32, #tpu.memory_space<vmem>>, vector<1x1x128xf32>,
    return
  }
  func.func @transform_0(%arg0: i32) -> (i32, i32) {
    %c0_i32 = arith.constant 0 : i32
    %c0_i32_0 = arith.constant 0 : i32
    return %arg0, %c0_i32 : i32, i32
  }
  func.func @transform_1(%arg0: i32) -> (i32, i32) {
    %c0_i32 = arith.constant 0 : i32
    %c0_i32_0 = arith.constant 0 : i32
    %c0_i32_1 = arith.constant 0 : i32
    return %c0_i32, %c0_i32_0 : i32, i32
  }
  func.func @transform_2(%arg0: i32) -> (i32, i32) {
    %c0_i32 = arith.constant 0 : i32
    %c0_i32_0 = arith.constant 0 : i32
    %c0_i32_1 = arith.constant 0 : i32
    return %c0_i32, %c0_i32_0 : i32, i32
  }
  func.func @transform_3(%arg0: i32) -> (i32, i32) {
    %c0_i32 = arith.constant 0 : i32
    %c0_i32_0 = arith.constant 0 : i32
    %c0_i32_1 = arith.constant 0 : i32
    return %c0_i32, %c0_i32_0 : i32, i32
  }
  func.func @transform_4(%arg0: i32) -> (i32, i32) {
    %c0_i32 = arith.constant 0 : i32
    %c0_i32_0 = arith.constant 0 : i32
    %c0_i32_1 = arith.constant 0 : i32
    return %c0_i32, %c0_i32_0 : i32, i32
  }
  func.func @transform_5(%arg0: i32) -> (i32, i32) {
    %c0_i32 = arith.constant 0 : i32
    %c0_i32_0 = arith.constant 0 : i32
    %c0_i32_1 = arith.constant 0 : i32
    return %c0_i32, %c0_i32_0 : i32, i32
  }
  func.func @transform_6(%arg0: i32) -> (i32, i32) {
    %c0_i32 = arith.constant 0 : i32
    %c0_i32_0 = arith.constant 0 : i32
    %c0_i32_1 = arith.constant 0 : i32
    return %c0_i32, %c0_i32_0 : i32, i32
  }
  func.func @transform_7(%arg0: i32) -> (i32, i32) {
    %c0_i32 = arith.constant 0 : i32
    %c0_i32_0 = arith.constant 0 : i32
    %c0_i32_1 = arith.constant 0 : i32
    return %c0_i32, %c0_i32_0 : i32, i32
  }
  func.func @transform_8(%arg0: i32) -> (i32, i32) {
    %c0_i32 = arith.constant 0 : i32
    %c0_i32_0 = arith.constant 0 : i32
    %c0_i32_1 = arith.constant 0 : i32
    return %c0_i32, %c0_i32_0 : i32, i32
  }
  func.func @transform_9(%arg0: i32) -> (i32, i32, i32) {
    %c0_i32 = arith.constant 0 : i32
    %c0_i32_0 = arith.constant 0 : i32
    %c0_i32_1 = arith.constant 0 : i32
    return %arg0, %c0_i32, %c0_i32_0 : i32, i32, i32
  }
}

</mosaic_0001>

<bundles_post_ra>
// kernel: densenet_pre_net_forward.1
= control target key start
LH: loop header
LB: loop body
LE: loop exit
PB: predicated region body
PF: predicated region fallthrough
CT: control target
= control target key end

     0   :  { %14 = vsyncpa [#allocation3], 0  ;;  %s2707_s0 = inlined_call_operand.vmem [shape: bf16[128,36], index: 0, kind: input, shape index: {}]   ;;  %s2708_s1 = inlined_call_operand.vmem [shape: bf16[36,128], index: 1, kind: input, shape index: {}]   ;;  %s2709_s2 = inlined_call_operand.vmem [shape: f32[1,128], index: 2, kind: input, shape index: {}]   ;;  %s2710_s3 = inlined_call_operand.vmem [shape: bf16[128,512], index: 3, kind: input, shape index: {}]   ;;  %s2711_s4 = inlined_call_operand.vmem [shape: f32[1,512], index: 4, kind: input, shape index: {}]   ;;  %s2712_s5 = inlined_call_operand.vmem [shape: bf16[512,256], index: 5, kind: input, shape index: {}]   ;;  %s2713_s6 = inlined_call_operand.vmem [shape: f32[1,256], index: 6, kind: input, shape index: {}]   ;;  %s2714_s7 = inlined_call_operand.vmem [shape: bf16[256,128], index: 7, kind: input, shape index: {}]   ;;  %s2715_s8 = inlined_call_operand.vmem [shape: f32[1,128], index: 8, kind: input, shape index: {}]   ;;  %s2716_s9 = inlined_call_operand.hbm [shape: f32[2,1,128], index: 9, kind: output, shape index: {}]  }
   0x1   :  { %16 = vsyncpa [#allocation3 + $0x1], 0  ;;  %s2179_s30 = smov 0   ;;  %s2181_s10 = smov 0  }
   0x2   :  { %s2183_s11 = smov 0   ;;  %s2185_s12 = smov 0  }
   0x3 LB: > { %s2200_s13 = sadd.s32 4294967295, %s2125_s12   ;;  %s1669_s14 = sadd.s32 4294967294, %s2125_s12   ;;  %s2125_s12 = sphi %s2185_s12, %s2722_s12   ;;  %s2121_s11 = sphi %s2183_s11, %s2721_s11   ;;  %s2117_s10 = sphi %s2181_s10, %s2720_s10   ;;  %s2113_s30 = sphi %s2179_s30, %s2719_s30  }
   0x4   : > { %s2204_s15 = sadd.s32 1, %s2125_s12   ;;  %s223_s16 = sadd.s32 1, %s2121_s11 }
   0x5   : > { %s220_s17 = ssub.s32 %s2125_s12, %s2204_s15  ;;  %p233_p0 = scmp.ne.s32.totalorder %s2121_s11, %s2117_s10 }
   0x6   : > { %p221_p1 = scmp.eq.s32.totalorder %s220_s17, 0  ;;  %p234_p2 = scmp.eq.s32.totalorder %s2200_s13, 1 }
   0x7   : > { %p239_p3 = scmp.ne.s32.totalorder %s2117_s10, %s2113_s30  ;;  %p240_p4 = scmp.eq.s32.totalorder %s1669_s14, 1 }
   0x8   : > { %s2215_s18 = scalar_select %p221_p1, %s2121_s11, %s223_s16  }
   0x9   : > { %p2217_p5 = por %p234_p2, %p233_p0  ;;  %p2221_p6 = por %p240_p4, %p239_p3 }
   0xa   : > { %p1672_p7 = scmp.ge.s32.totalorder %s2125_s12, 1  ;;  %p291_p8 = scmp.lt.s32.totalorder %s2125_s12, 3 }
   0xc   : > { %p292_p9 = pnand %p1672_p7, %p291_p8 }
   0xd   : > { %v1892_v0 = vld [vmem:[%s2708_s1] sm:$0xff] (!%p292_p9)   ;;  %v1893_v1 = vld [vmem:[%s2708_s1 + $0x8] sm:$0xff] (!%p292_p9)   ;;  %s1673_s25 = sshll.u32 (!%p292_p9), %s2200_s13, 3  ;;  %v1894_v2 = vld [vmem:[%s2708_s1 + $0x10] ss:$0 sps:$4 sm:$0x33] (!%p292_p9)  }
   0xe   : > { %295 = sbr.rel (%p292_p9) target bundleno = 1342 (0x53e), region = 56  ;;  %1831 = vmatprep.subr.bf16.mxu0 (!%p292_p9), %v1892_v0  ;;  %p327_p10 = scmp.lt.s32.totalorder (!%p292_p9), %s1673_s25, 15  ;;  %vm401_vm0 = vcmask (!%p292_p9), 1041408   ;;  %vm388_vm1 = vcmask (!%p292_p9), 293888   ;;  %v1901_v3 = vld [vmem:[%s2710_s3 + $0x4] ss:$16 sps:$4 sm:$0xff] (!%p292_p9)  }
   0xf   : > { %1832 = vmatpush3.bf16.msra.mxu0 (!%p292_p9), %v1892_v0  ;;  %v403_v4 = vsel (!%p292_p9), %vm401_vm0, %v1894_v2, 0  ;;  %v1899_v6 = vld [vmem:[%s2710_s3] ss:$16 sps:$4 sm:$0xff] (!%p292_p9)   ;;  %v1904_v9 = vld [vmem:[%s2710_s3 + $0x24] ss:$16 sps:$4 sm:$0xff] (!%p292_p9)   ;;  %v2127_v25 = vmov (!%p292_p9), 0  }
  0x10   : > { %1833 = vmatprep.subr.bf16.mxu0 (!%p292_p9), %v1893_v1  ;;  %v1902_v10 = vld [vmem:[%s2710_s3 + $0x20] ss:$16 sps:$4 sm:$0xff] (!%p292_p9)   ;;  %v1907_v11 = vld [vmem:[%s2710_s3 + $0x44] ss:$16 sps:$4 sm:$0xff] (!%p292_p9)   ;;  %v1925_v24 = vld [vmem:[%s2710_s3 + $0xc] ss:$16 sps:$4 sm:$0xff] (!%p292_p9)  }
  0x11   : > { %v1905_v13 = vld [vmem:[%s2710_s3 + $0x40] ss:$16 sps:$4 sm:$0xff] (!%p292_p9)   ;;  %v1910_v14 = vld [vmem:[%s2710_s3 + $0x64] ss:$16 sps:$4 sm:$0xff] (!%p292_p9)   ;;  %v1923_v48 = vld [vmem:[%s2710_s3 + $0x8] ss:$16 sps:$4 sm:$0xff] (!%p292_p9)  }
  0x12   : > { %v1908_v15 = vld [vmem:[%s2710_s3 + $0x60] ss:$16 sps:$4 sm:$0xff] (!%p292_p9)   ;;  %v1913_v16 = vld [vmem:[%s2710_s3 + $0x84] ss:$16 sps:$4 sm:$0xff] (!%p292_p9)   ;;  %v1928_v51 = vld [vmem:[%s2710_s3 + $0x2c] ss:$16 sps:$4 sm:$0xff] (!%p292_p9)  }
  0x13   : > { %1834 = vmatpush3.bf16.msra.mxu0 (!%p292_p9), %v1893_v1  ;;  %v1911_v17 = vld [vmem:[%s2710_s3 + $0x80] ss:$16 sps:$4 sm:$0xff] (!%p292_p9)   ;;  %v1916_v18 = vld [vmem:[%s2710_s3 + $0xa4] ss:$16 sps:$4 sm:$0xff] (!%p292_p9)   ;;  %v1926_v57 = vld [vmem:[%s2710_s3 + $0x28] ss:$16 sps:$4 sm:$0xff] (!%p292_p9)  }
  0x14   : > { %1851 = vmatprep.subr.msk.bf16.mxu0 (!%p292_p9), %vm401_vm0, %v1894_v2  ;;  %v1914_v19 = vld [vmem:[%s2710_s3 + $0xa0] ss:$16 sps:$4 sm:$0xff] (!%p292_p9)   ;;  %v1919_v20 = vld [vmem:[%s2710_s3 + $0xc4] ss:$16 sps:$4 sm:$0xff] (!%p292_p9)   ;;  %v1931_v62 = vld [vmem:[%s2710_s3 + $0x4c] ss:$16 sps:$4 sm:$0xff] (!%p292_p9)  }
  0x15   : > { %s2724_s25 = smov (!%p327_p10, %s1673_s25), 15  ;;  %v1917_v21 = vld [vmem:[%s2710_s3 + $0xc0] ss:$16 sps:$4 sm:$0xff]   ;;  %v1922_v22 = vld [vmem:[%s2710_s3 + $0xe4] ss:$16 sps:$4 sm:$0xff]   ;;  %vm1586_vm2 = vcmask 1040384  }
  0x16   : > { %s1674_s28 = sshll.u32 %s2724_s25, 2  ;;  %v1920_v23 = vld [vmem:[%s2710_s3 + $0xe0] ss:$16 sps:$4 sm:$0xff]   ;;  %v1947_v26 = vld [vmem:[%s2712_s5 + $0x4] ss:$8 sps:$4 sm:$0xff]   ;;  %s324_s25 = sand.u32 1, %s2117_s10  }
  0x17   : > { %s330_s16 = scalar_lea.vmem %s2707_s0, %s1674_s28  ;;  %1836 = vmatpush3.bf16.msra.mxu0 %v403_v4  ;;  %v1949_v27 = vld [vmem:[%s2712_s5] ss:$8 sps:$4 sm:$0xff]   ;;  %v1950_v28 = vld [vmem:[%s2712_s5 + $0x14] ss:$8 sps:$4 sm:$0xff]   ;;  %1331 = vmatprep.subr.bf16.mxu1 %v1947_v26  ;;  %v1952_v29 = vld [vmem:[%s2712_s5 + $0x10] ss:$8 sps:$4 sm:$0xff]  }
  0x18   : > { %v1895_v5 = vld [vmem:[%s330_s16] sm:$0xff]   ;;  %v1896_v7 = vld [vmem:[%s330_s16 + $0x8] sm:$0xff]   ;;  %v1897_v8 = vld [vmem:[%s330_s16 + $0x10] sm:$0xff]   ;;  %696 = vmatprep.subr.bf16.mxu0 %v1901_v3  ;;  %1332 = vmatpush1.bf16.msra.mxu1 %v1949_v27  ;;  %s1799_s26 = sshll.u32 %s2200_s13, 4  ;;  %s1602_s17 = scalar_lea.sflag [#allocation3], %s324_s25 }
  0x19   : > { %1837 = vmatprep.mubr.msk.bf16.mxu0 %vm388_vm1, %v1895_v5  ;;  %v1898_v12 = vld [vmem:[%s330_s16 + $0x18] sm:$0xff]   ;;  %1333 = vmatprep.subr.bf16.mxu1 %v1950_v28  ;;  %v1953_v30 = vld [vmem:[%s2712_s5 + $0x24] ss:$8 sps:$4 sm:$0xff]   ;;  %v1955_v31 = vld [vmem:[%s2712_s5 + $0x20] ss:$8 sps:$4 sm:$0xff]   ;;  %s325_s16 = scalar_lea.vmem [#allocation2], %s324_s25  ;;  %s2665_s14 = scalar_lea.hbm %s2716_s9, %s1799_s26 }
  0x1a   : > { %1838 = vmatmul.mubr.msk.bf16.vlgmr.msra.gmra.mrb[0].mxu0 %vm388_vm1, %v1896_v7  ;;  %v1956_v32 = vld [vmem:[%s2712_s5 + $0x34] ss:$8 sps:$4 sm:$0xff]   ;;  %v1958_v33 = vld [vmem:[%s2712_s5 + $0x30] ss:$8 sps:$4 sm:$0xff]   ;;  %v1675_v34 = vld [vmem:[%s2709_s2] ss:$0 sm:$0xff] }
  0x1b   : > { %1841 = vmatprep.mubr.msk.bf16.mxu0 %vm388_vm1, %v1897_v8  ;;  %697 = vmatpush1.bf16.msra.mxu0 %v1899_v6  ;;  %v1929_v2 = vld [vmem:[%s2710_s3 + $0x48] ss:$16 sps:$4 sm:$0xff]   ;;  %v1934_v4 = vld [vmem:[%s2710_s3 + $0x6c] ss:$16 sps:$4 sm:$0xff]   ;;  %s1614_s27 = sshll.u32 %s325_s16, 4  ;;  %s2128_s13 = smov [#allocation2]   ;;  %s2667_s27 = int_to_ptr.vmem [resolvable:$true] %s1614_s27 }
  0x1c   : > { %698 = vmatprep.subr.bf16.mxu0 %v1904_v9  ;;  %1334 = vmatpush1.bf16.msra.mxu1 %v1952_v29  ;;  %v1932_v5 = vld [vmem:[%s2710_s3 + $0x68] ss:$16 sps:$4 sm:$0xff]   ;;  %v1937_v6 = vld [vmem:[%s2710_s3 + $0x8c] ss:$16 sps:$4 sm:$0xff]   ;;  %s2063_s21 = scalar_lea.vmem %s2667_s27, 16  ;;  %s2067_s22 = sshll.u32 %s2128_s13, 4  ;;  %s2068_s22 = int_to_ptr.vmem [resolvable:$false] %s2067_s22 }
  0x1d   : > { %1335 = vmatprep.subr.bf16.mxu1 %v1953_v30  ;;  %v1935_v7 = vld [vmem:[%s2710_s3 + $0x88] ss:$16 sps:$4 sm:$0xff]   ;;  %v1940_v8 = vld [vmem:[%s2710_s3 + $0xac] ss:$16 sps:$4 sm:$0xff]   ;;  %p2064_p11 = scmp.ne.s32.totalorder %s2667_s27, %s2063_s21  ;;  %s2069_s23 = scalar_lea.vmem %s2068_s22, 32 }
  0x1e   : > { %v1938_v9 = vld [vmem:[%s2710_s3 + $0xa8] ss:$16 sps:$4 sm:$0xff]   ;;  %v1977_v26 = vld [vmem:[%s2712_s5 + $0xa4] ss:$8 sps:$4 sm:$0xff]   ;;  %v1980_v28 = vld [vmem:[%s2712_s5 + $0xb4] ss:$8 sps:$4 sm:$0xff]   ;;  %p2070_p0 = scmp.lt.s32.totalorder %s2667_s27, %s2068_s22  ;;  %p2071_p1 = scmp.lt.s32.totalorder %s2069_s23, %s2063_s21 }
  0x1f   : > { %699 = vmatpush1.bf16.msra.mxu0 %v1902_v10  ;;  %v1943_v10 = vld [vmem:[%s2710_s3 + $0xcc] ss:$16 sps:$4 sm:$0xff]   ;;  %v1979_v27 = vld [vmem:[%s2712_s5 + $0xa0] ss:$8 sps:$4 sm:$0xff]   ;;  %v1982_v29 = vld [vmem:[%s2712_s5 + $0xb0] ss:$8 sps:$4 sm:$0xff]   ;;  %p2065_p12 = pnand %p2064_p11, %p2217_p5 }
  0x20   : > { %700 = vmatprep.subr.bf16.mxu0 %v1907_v11  ;;  %1336 = vmatpush1.bf16.msra.mxu1 %v1955_v31  ;;  %v1941_v11 = vld [vmem:[%s2710_s3 + $0xc8] ss:$16 sps:$4 sm:$0xff]   ;;  %v1983_v30 = vld [vmem:[%s2712_s5 + $0xc4] ss:$8 sps:$4 sm:$0xff]   ;;  %p2072_p2 = por %p2071_p1, %p2070_p0 }
  0x21   : > { %1337 = vmatprep.subr.bf16.mxu1 %v1956_v32  ;;  %v1985_v31 = vld [vmem:[%s2712_s5 + $0xc0] ss:$8 sps:$4 sm:$0xff]   ;;  %v1986_v32 = vld [vmem:[%s2712_s5 + $0xd4] ss:$8 sps:$4 sm:$0xff]   ;;  %p2066_p13 = pneg %p2065_p12 }
  0x22   : > { %1842 = vmatmul.mubr.msk.bf16.gmra.mrb[4].mxu0 %vm388_vm1, %v1898_v12  ;;  %v1946_v12 = vld [vmem:[%s2710_s3 + $0xec] ss:$16 sps:$4 sm:$0xff]  }
  0x23   : > { %701 = vmatpush1.bf16.msra.mxu0 %v1905_v13  ;;  %728 = vmatprep.mubr.bf16.mxu0 %v2127_v25  ;;  %v1944_v13 = vld [vmem:[%s2710_s3 + $0xe8] ss:$16 sps:$4 sm:$0xff]   ;;  %p2073_p3 = pnand %p2072_p2, %p2066_p13 }
  0x24   : > { %702 = vmatprep.subr.bf16.mxu0 %v1910_v14  ;;  %1338 = vmatpush1.bf16.msra.mxu1 %v1958_v33  ;;  %v1959_v14 = vld [vmem:[%s2712_s5 + $0x44] ss:$8 sps:$4 sm:$0xff]   ;;  %v1988_v33 = vld [vmem:[%s2712_s5 + $0xd0] ss:$8 sps:$4 sm:$0xff]  }
  0x25   : > { %1339 = vmatprep.subr.bf16.mxu1 %v1959_v14 }
  0x27   : > { %703 = vmatpush1.bf16.msra.mxu0 %v1908_v15  ;;  %v1961_v15 = vld [vmem:[%s2712_s5 + $0x40] ss:$8 sps:$4 sm:$0xff]  }
  0x28   : > { %704 = vmatprep.subr.bf16.mxu0 %v1913_v16  ;;  %1340 = vmatpush1.bf16.msra.mxu1 %v1961_v15  ;;  %v1962_v16 = vld [vmem:[%s2712_s5 + $0x54] ss:$8 sps:$4 sm:$0xff]  }
  0x29   : > { %1341 = vmatprep.subr.bf16.mxu1 %v1962_v16 }
  0x2b   : > { %705 = vmatpush1.bf16.msra.mxu0 %v1911_v17  ;;  %v1964_v17 = vld [vmem:[%s2712_s5 + $0x50] ss:$8 sps:$4 sm:$0xff]  }
  0x2c   : > { %706 = vmatprep.subr.bf16.mxu0 %v1916_v18  ;;  %1342 = vmatpush1.bf16.msra.mxu1 %v1964_v17  ;;  %v1965_v18 = vld [vmem:[%s2712_s5 + $0x64] ss:$8 sps:$4 sm:$0xff]  }
  0x2d   : > { %1343 = vmatprep.subr.bf16.mxu1 %v1965_v18 }
  0x2f   : > { %707 = vmatpush1.bf16.msra.mxu0 %v1914_v19  ;;  %v1967_v19 = vld [vmem:[%s2712_s5 + $0x60] ss:$8 sps:$4 sm:$0xff]  }
  0x30   : > { %708 = vmatprep.subr.bf16.mxu0 %v1919_v20  ;;  %1344 = vmatpush1.bf16.msra.mxu1 %v1967_v19  ;;  %v1968_v20 = vld [vmem:[%s2712_s5 + $0x74] ss:$8 sps:$4 sm:$0xff]  }
  0x31   : > { %1345 = vmatprep.subr.bf16.mxu1 %v1968_v20 }
  0x33   : > { %709 = vmatpush1.bf16.msra.mxu0 %v1917_v21  ;;  %v1970_v21 = vld [vmem:[%s2712_s5 + $0x70] ss:$8 sps:$4 sm:$0xff]  }
  0x34   : > { %710 = vmatprep.subr.bf16.mxu0 %v1922_v22  ;;  %1346 = vmatpush1.bf16.msra.mxu1 %v1970_v21  ;;  %v1971_v22 = vld [vmem:[%s2712_s5 + $0x84] ss:$8 sps:$4 sm:$0xff]  }
  0x35   : > { %1347 = vmatprep.subr.bf16.mxu1 %v1971_v22 }
  0x37   : > { %711 = vmatpush1.bf16.msra.mxu0 %v1920_v23  ;;  %v1973_v23 = vld [vmem:[%s2712_s5 + $0x80] ss:$8 sps:$4 sm:$0xff]  }
  0x38   : > { %769 = vmatprep.subr.bf16.mxu0 %v1925_v24  ;;  %1348 = vmatpush1.bf16.msra.mxu1 %v1973_v23  ;;  %v1974_v24 = vld [vmem:[%s2712_s5 + $0x94] ss:$8 sps:$4 sm:$0xff]  }
  0x39   : > { %1349 = vmatprep.subr.bf16.mxu1 %v1974_v24 }
  0xed   : > { %v1839_v35 = vpop.f32.mrb[0].mxu0 }
  0xee   : > { %v448_v36 = vadd.f32 %v1839_v35, %v1675_v34  ;;  %v439_v37 = vpop.f32.mrb[1].mxu0  ;;  %v1991_v35 = vld [vmem:[%s2712_s5 + $0xe0] ss:$8 sps:$4 sm:$0xff]  }
  0xef   : > { %v440_v38 = vadd.f32 %v1675_v34, %v439_v37  ;;  %v1840_v39 = vpop.f32.mrb[2].mxu0  ;;  %v1994_v37 = vld [vmem:[%s2712_s5 + $0xf0] ss:$8 sps:$4 sm:$0xff]  }
  0xf0   : > { %v451_v40 = vadd.f32 %v1840_v39, %v1675_v34  ;;  %v442_v41 = vpop.f32.mrb[3].mxu0  ;;  %v472_v43 = vmax.f32 %v448_v36, 0.0  ;;  %v1992_v36 = vld [vmem:[%s2712_s5 + $0xf4] ss:$8 sps:$4 sm:$0xff]   ;;  %v516_v39 = vlaneseq }
  0xf1   : > { %v443_v42 = vadd.f32 %v1675_v34, %v442_v41  ;;  %v470_v45 = vmax.f32 %v440_v38, 0.0  ;;  %v1997_v38 = vld [vmem:[%s2712_s5 + $0x104] ss:$8 sps:$4 sm:$0xff]  }
  0xf2   : > { %v473_v44 = vmax.f32 %v451_v40, 0.0  ;;  %v2043_v40 = vld [vmem:[%s2714_s7 + $0x40] sm:$0xff]  }
  0xf3   : > { %v471_v46 = vmax.f32 %v443_v42, 0.0  ;;  %v2044_v41 = vld [vmem:[%s2714_s7] sm:$0xff]   ;;  %v2045_v42 = vld [vmem:[%s2714_s7 + $0x48] sm:$0xff]  }
  0xf4   : > { %v479_v47 = vpack.c.bf16 %v473_v44, %v472_v43  ;;  %v2459_v43 = vshrl.u32 %v516_v39, 7  ;;  %v2046_v44 = vld [vmem:[%s2714_s7 + $0x8] sm:$0xff]  }
  0xf5   : > { %v478_v49 = vpack.c.bf16 %v471_v46, %v470_v45  ;;  %v1843_v50 = vpop.f32.mrb[4].mxu0  ;;  %v2047_v45 = vld [vmem:[%s2714_s7 + $0x50] sm:$0xff]  }
  0xf6   : > { %v464_v52 = vadd.f32 %v1843_v50, %v1675_v34  ;;  %v455_v53 = vpop.f32.mrb[5].mxu0  ;;  %v518_v46 = vsub.s32 0, %v2459_v43  ;;  %v2049_v50 = vld [vmem:[%s2714_s7 + $0x58] sm:$0xff]  }
  0xf7   : > { %729 = vmatmul.mubr.bf16.vlgmr.msra.gmra.mrb[8].mxu0 %v478_v49  ;;  %v456_v54 = vadd.f32 %v1675_v34, %v455_v53  ;;  %v1844_v55 = vpop.f32.mrb[6].mxu0  ;;  %v2050_v53 = vld [vmem:[%s2714_s7 + $0x18] sm:$0xff]  }
  0xf8   : > { %770 = vmatpush1.bf16.msra.mxu0 %v1923_v48  ;;  %v476_v56 = vmax.f32 %v464_v52, 0.0  ;;  %v467_v58 = vadd.f32 %v1844_v55, %v1675_v34  ;;  %v458_v59 = vpop.f32.mrb[7].mxu0  ;;  %738 = vmatprep.mubr.bf16.mxu0 %v2127_v25  ;;  %v522_v48 = vsub.s32 1, %v2459_v43 }
  0xf9   : > { %v474_v60 = vmax.f32 %v456_v54, 0.0  ;;  %771 = vmatprep.subr.bf16.mxu0 %v1928_v51  ;;  %v459_v61 = vadd.f32 %v1675_v34, %v458_v59  ;;  %v1989_v34 = vld [vmem:[%s2712_s5 + $0xe4] ss:$8 sps:$4 sm:$0xff]  }
  0xfa   : > { %v477_v63 = vmax.f32 %v467_v58, 0.0  ;;  %v2051_v54 = vld [vmem:[%s2714_s7 + $0x60] sm:$0xff]  }
  0xfb   : > { %v475_v0 = vmax.f32 %v459_v61, 0.0 }
  0xfc   : > { %v481_v1 = vpack.c.bf16 %v477_v63, %v476_v56  ;;  %772 = vmatpush1.bf16.msra.mxu0 %v1926_v57  ;;  %v2053_v63 = vld [vmem:[%s2714_s7 + $0x68] sm:$0xff]  }
  0xfd   : > { %v480_v3 = vpack.c.bf16 %v475_v0, %v474_v60  ;;  %773 = vmatprep.subr.bf16.mxu0 %v1931_v62  ;;  %v2052_v60 = vld [vmem:[%s2714_s7 + $0x20] sm:$0xff]  }
  0xff   : > { %739 = vmatmul.mubr.bf16.gmra.mrb[12].mxu0 %v479_v47 }
 0x100   : > { %774 = vmatpush1.bf16.msra.mxu0 %v1929_v2  ;;  %748 = vmatprep.mubr.bf16.mxu0 %v2127_v25 }
 0x101   : > { %775 = vmatprep.subr.bf16.mxu0 %v1934_v4 }
 0x104   : > { %776 = vmatpush1.bf16.msra.mxu0 %v1932_v5  ;;  %v2054_v5 = vld [vmem:[%s2714_s7 + $0x28] sm:$0xff]  }
 0x105   : > { %777 = vmatprep.subr.bf16.mxu0 %v1937_v6 }
 0x107   : > { %749 = vmatmul.mubr.bf16.gmra.mrb[16].mxu0 %v480_v3 }
 0x108   : > { %778 = vmatpush1.bf16.msra.mxu0 %v1935_v7  ;;  %758 = vmatprep.mubr.bf16.mxu0 %v2127_v25 }
 0x109   : > { %779 = vmatprep.subr.bf16.mxu0 %v1940_v8 }
 0x10c   : > { %780 = vmatpush1.bf16.msra.mxu0 %v1938_v9 }
 0x10d   : > { %781 = vmatprep.subr.bf16.mxu0 %v1943_v10 }
 0x10f   : > { %759 = vmatmul.mubr.bf16.gmra.mrb[20].mxu0 %v481_v1 }
 0x110   : > { %782 = vmatpush1.bf16.msra.mxu0 %v1941_v11  ;;  %801 = vmatprep.mubr.bf16.mxu0 %v2127_v25 }
 0x111   : > { %783 = vmatprep.subr.bf16.mxu0 %v1946_v12 }
 0x114   : > { %784 = vmatpush1.bf16.msra.mxu0 %v1944_v13 }
 0x115   : > { %1809 = vmatprep.subr.bf16.mxu0 %v2043_v40 }
 0x117   : > { %802 = vmatmul.mubr.bf16.vlgmr.msra.gmra.mrb[24].mxu0 %v478_v49  ;;  %v2048_v49 = vld [vmem:[%s2714_s7 + $0x10] sm:$0xff]  }
 0x118   : > { %811 = vmatprep.mubr.bf16.mxu0 %v2127_v25  ;;  %1810 = vmatpush3.bf16.msra.mxu0 %v2044_v41 }
 0x119   : > { %1811 = vmatprep.subr.bf16.mxu0 %v2045_v42 }
 0x11c   : > { %1812 = vmatpush3.bf16.msra.mxu0 %v2046_v44  ;;  %v526_v44 = vsub.s32 2, %v2459_v43 }
 0x11d   : > { %1813 = vmatprep.subr.bf16.mxu0 %v2047_v45 }
 0x11f   : > { %812 = vmatmul.mubr.bf16.gmra.mrb[28].mxu0 %v479_v47  ;;  %v2471_v47 = vld [vmem:[%s2711_s4] sm:$0xf] }
 0x120   : > { %821 = vmatprep.mubr.bf16.mxu0 %v2127_v25  ;;  %v2483_v51 = vrot.slane %v2471_v47, %v518_v46  ;;  %v2488_v52 = vrot.slane %v2471_v47, %v522_v48  ;;  %1814 = vmatpush3.bf16.msra.mxu0 %v2048_v49 }
 0x121   : > { %1815 = vmatprep.subr.bf16.mxu0 %v2049_v50  ;;  %v530_v50 = vsub.s32 3, %v2459_v43 }
 0x124   : > { %1816 = vmatpush3.bf16.msra.mxu0 %v2050_v53 }
 0x125   : > { %1817 = vmatprep.subr.bf16.mxu0 %v2051_v54 }
 0x127   : > { %822 = vmatmul.mubr.bf16.gmra.mrb[32].mxu0 %v480_v3 }
 0x128   : > { %831 = vmatprep.mubr.bf16.mxu0 %v2127_v25  ;;  %v1976_v25 = vld [vmem:[%s2712_s5 + $0x90] ss:$8 sps:$4 sm:$0xff]   ;;  %1818 = vmatpush3.bf16.msra.mxu0 %v2052_v60  ;;  %v2524_v60 = vrot.slane %v2471_v47, %v526_v44 }
 0x129   : > { %1350 = vmatpush1.bf16.msra.mxu1 %v1976_v25  ;;  %1819 = vmatprep.subr.bf16.mxu0 %v2053_v63  ;;  %v2527_v63 = vrot.slane %v2471_v47, %v530_v50 }
 0x12a   : > { %1351 = vmatprep.subr.bf16.mxu1 %v1977_v26 }
 0x12c   : > { %1820 = vmatpush3.bf16.msra.mxu0 %v2054_v5 }
 0x12d   : > { %1352 = vmatpush1.bf16.msra.mxu1 %v1979_v27 }
 0x12e   : > { %1353 = vmatprep.subr.bf16.mxu1 %v1980_v28 }
 0x12f   : > { %832 = vmatmul.mubr.bf16.gmra.mrb[36].mxu0 %v481_v1 }
 0x131   : > { %1354 = vmatpush1.bf16.msra.mxu1 %v1982_v29 }
 0x132   : > { %1355 = vmatprep.subr.bf16.mxu1 %v1983_v30 }
 0x135   : > { %1356 = vmatpush1.bf16.msra.mxu1 %v1985_v31 }
 0x136   : > { %1357 = vmatprep.subr.bf16.mxu1 %v1986_v32 }
 0x139   : > { %1358 = vmatpush1.bf16.msra.mxu1 %v1988_v33 }
 0x13a   : > { %1359 = vmatprep.subr.bf16.mxu1 %v1989_v34 }
 0x13d   : > { %1360 = vmatpush1.bf16.msra.mxu1 %v1991_v35 }
 0x13e   : > { %1361 = vmatprep.subr.bf16.mxu1 %v1992_v36 }
 0x141   : > { %1362 = vmatpush1.bf16.msra.mxu1 %v1994_v37 }
 0x142   : > { %1372 = vmatprep.subr.bf16.mxu1 %v1997_v38 }
 0x1ca   : > { %v730_v55 = vpop.f32.mrb[8].mxu0 }
 0x1cb   : > { %v731_v56 = vadd.f32 %v730_v55, %v2483_v51  ;;  %v732_v57 = vpop.f32.mrb[9].mxu0 }
 0x1cc   : > { %v733_v58 = vadd.f32 %v732_v57, %v2488_v52  ;;  %v734_v59 = vpop.f32.mrb[10].mxu0 }
 0x1cd   : > { %v735_v61 = vadd.f32 %v734_v59, %v2483_v51  ;;  %v736_v62 = vpop.f32.mrb[11].mxu0  ;;  %v842_v1 = vmax.f32 %v731_v56, 0.0 }
 0x1ce   : > { %v737_v0 = vadd.f32 %v736_v62, %v2488_v52  ;;  %v843_v3 = vmax.f32 %v733_v58, 0.0 }
 0x1cf   : > { %v846_v2 = vmax.f32 %v735_v61, 0.0 }
 0x1d0   : > { %v847_v4 = vmax.f32 %v737_v0, 0.0 }
 0x1d1   : > { %v874_v6 = vadd.f32 %v846_v2, %v842_v1 }
 0x1d2   : > { %v887_v7 = vadd.f32 %v847_v4, %v843_v3  ;;  %v740_v8 = vpop.f32.mrb[12].mxu0 }
 0x1d3   : > { %v741_v9 = vadd.f32 %v740_v8, %v2483_v51  ;;  %v742_v10 = vpop.f32.mrb[13].mxu0 }
 0x1d4   : > { %v743_v11 = vadd.f32 %v742_v10, %v2488_v52  ;;  %v744_v12 = vpop.f32.mrb[14].mxu0 }
 0x1d5   : > { %v850_v13 = vmax.f32 %v741_v9, 0.0  ;;  %v745_v14 = vadd.f32 %v744_v12, %v2483_v51  ;;  %v746_v15 = vpop.f32.mrb[15].mxu0 }
 0x1d6   : > { %v851_v16 = vmax.f32 %v743_v11, 0.0  ;;  %v747_v17 = vadd.f32 %v746_v15, %v2488_v52 }
 0x1d7   : > { %v875_v18 = vadd.f32 %v874_v6, %v850_v13  ;;  %v854_v19 = vmax.f32 %v745_v14, 0.0 }
 0x1d8   : > { %v888_v20 = vadd.f32 %v887_v7, %v851_v16  ;;  %v855_v21 = vmax.f32 %v747_v17, 0.0 }
 0x1d9   : > { %v876_v22 = vadd.f32 %v875_v18, %v854_v19 }
 0x1da   : > { %v889_v23 = vadd.f32 %v888_v20, %v855_v21  ;;  %v750_v24 = vpop.f32.mrb[16].mxu0 }
 0x1db   : > { %v751_v25 = vadd.f32 %v750_v24, %v2483_v51  ;;  %v752_v26 = vpop.f32.mrb[17].mxu0 }
 0x1dc   : > { %v753_v27 = vadd.f32 %v752_v26, %v2488_v52  ;;  %v754_v28 = vpop.f32.mrb[18].mxu0 }
 0x1dd   : > { %v858_v29 = vmax.f32 %v751_v25, 0.0  ;;  %v755_v30 = vadd.f32 %v754_v28, %v2483_v51  ;;  %v756_v31 = vpop.f32.mrb[19].mxu0 }
 0x1de   : > { %v859_v32 = vmax.f32 %v753_v27, 0.0  ;;  %v757_v33 = vadd.f32 %v756_v31, %v2488_v52 }
 0x1df   : > { %v877_v34 = vadd.f32 %v876_v22, %v858_v29  ;;  %v862_v35 = vmax.f32 %v755_v30, 0.0 }
 0x1e0   : > { %v890_v36 = vadd.f32 %v889_v23, %v859_v32  ;;  %v863_v37 = vmax.f32 %v757_v33, 0.0 }
 0x1e1   : > { %v878_v38 = vadd.f32 %v877_v34, %v862_v35 }
 0x1e2   : > { %v891_v39 = vadd.f32 %v890_v36, %v863_v37  ;;  %v760_v40 = vpop.f32.mrb[20].mxu0 }
 0x1e3   : > { %v761_v41 = vadd.f32 %v760_v40, %v2483_v51  ;;  %v762_v42 = vpop.f32.mrb[21].mxu0 }
 0x1e4   : > { %v763_v45 = vadd.f32 %v762_v42, %v2488_v52  ;;  %v764_v49 = vpop.f32.mrb[22].mxu0 }
 0x1e5   : > { %v866_v53 = vmax.f32 %v761_v41, 0.0  ;;  %v765_v54 = vadd.f32 %v764_v49, %v2483_v51  ;;  %v766_v55 = vpop.f32.mrb[23].mxu0  ;;  %v1995_v49 = vld [vmem:[%s2712_s5 + $0x100] ss:$8 sps:$4 sm:$0xff]  }
 0x1e6   : > { %v867_v56 = vmax.f32 %v763_v45, 0.0  ;;  %v767_v57 = vadd.f32 %v766_v55, %v2488_v52  ;;  %v2000_v55 = vld [vmem:[%s2712_s5 + $0x114] ss:$8 sps:$4 sm:$0xff]  }
 0x1e7   : > { %v879_v58 = vadd.f32 %v878_v38, %v866_v53  ;;  %v870_v59 = vmax.f32 %v765_v54, 0.0 }
 0x1e8   : > { %v892_v61 = vadd.f32 %v891_v39, %v867_v56  ;;  %v871_v62 = vmax.f32 %v767_v57, 0.0 }
 0x1e9   : > { %v880_v0 = vadd.f32 %v879_v58, %v870_v59 }
 0x1ea   : > { %v893_v1 = vadd.f32 %v892_v61, %v871_v62  ;;  %v803_v2 = vpop.f32.mrb[24].mxu0 }
 0x1eb   : > { %v881_v3 = vrot.slane %v880_v0, 4  ;;  %v804_v51 = vadd.f32 %v803_v2, %v2524_v60  ;;  %v805_v4 = vpop.f32.mrb[25].mxu0 }
 0x1ec   : > { %v894_v5 = vrot.slane %v893_v1, 4  ;;  %v806_v52 = vadd.f32 %v805_v4, %v2527_v63  ;;  %v807_v6 = vpop.f32.mrb[26].mxu0 }
 0x1ed   : > { %v882_v7 = vadd.f32 %v881_v3, %v880_v0  ;;  %v808_v8 = vadd.f32 %v807_v6, %v2524_v60  ;;  %v809_v9 = vpop.f32.mrb[27].mxu0  ;;  %v844_v12 = vmax.f32 %v804_v51, 0.0  ;;  %v2003_v51 = vld [vmem:[%s2712_s5 + $0x124] ss:$8 sps:$4 sm:$0xff]  }
 0x1ee   : > { %v810_v10 = vadd.f32 %v809_v9, %v2527_v63  ;;  %v895_v11 = vadd.f32 %v894_v5, %v893_v1  ;;  %v845_v14 = vmax.f32 %v806_v52, 0.0  ;;  %v1998_v1 = vld [vmem:[%s2712_s5 + $0x110] ss:$8 sps:$4 sm:$0xff]  }
 0x1ef   : > { %v883_v47 = vrot.slane %v882_v7, 2  ;;  %v848_v13 = vmax.f32 %v808_v8, 0.0  ;;  %v2001_v8 = vld [vmem:[%s2712_s5 + $0x120] ss:$8 sps:$4 sm:$0xff]  }
 0x1f0   : > { %v849_v15 = vmax.f32 %v810_v10, 0.0  ;;  %v896_v16 = vrot.slane %v895_v11, 2 }
 0x1f1   : > { %v900_v17 = vadd.f32 %v848_v13, %v844_v12  ;;  %v884_v18 = vadd.f32 %v883_v47, %v882_v7 }
 0x1f2   : > { %v913_v19 = vadd.f32 %v849_v15, %v845_v14  ;;  %v813_v20 = vpop.f32.mrb[28].mxu0  ;;  %v897_v21 = vadd.f32 %v896_v16, %v895_v11  ;;  %v2006_v11 = vld [vmem:[%s2712_s5 + $0x134] ss:$8 sps:$4 sm:$0xff]  }
 0x1f3   : > { %v814_v22 = vadd.f32 %v813_v20, %v2524_v60  ;;  %v815_v23 = vpop.f32.mrb[29].mxu0  ;;  %v885_v24 = vrot.slane %v884_v18, 1 }
 0x1f4   : > { %v816_v25 = vadd.f32 %v815_v23, %v2527_v63  ;;  %v817_v26 = vpop.f32.mrb[30].mxu0  ;;  %v898_v27 = vrot.slane %v897_v21, 1 }
 0x1f5   : > { %v852_v28 = vmax.f32 %v814_v22, 0.0  ;;  %v818_v29 = vadd.f32 %v817_v26, %v2524_v60  ;;  %v819_v30 = vpop.f32.mrb[31].mxu0  ;;  %v886_v31 = vadd.f32 %v885_v24, %v884_v18  ;;  %v2004_v18 = vld [vmem:[%s2712_s5 + $0x130] ss:$8 sps:$4 sm:$0xff]  }
 0x1f6   : > { %v853_v32 = vmax.f32 %v816_v25, 0.0  ;;  %v820_v33 = vadd.f32 %v819_v30, %v2527_v63  ;;  %v899_v34 = vadd.f32 %v898_v27, %v897_v21  ;;  %v2009_v21 = vld [vmem:[%s2712_s5 + $0x144] ss:$8 sps:$4 sm:$0xff]   ;;  %v2012_v25 = vld [vmem:[%s2712_s5 + $0x154] ss:$8 sps:$4 sm:$0xff]  }
 0x1f7   : > { %v901_v35 = vadd.f32 %v900_v17, %v852_v28  ;;  %v856_v36 = vmax.f32 %v818_v29, 0.0  ;;  %v927_v37 = vmul.f32 0.015625, %v886_v31  ;;  %v2010_v28 = vld [vmem:[%s2712_s5 + $0x150] ss:$8 sps:$4 sm:$0xff]   ;;  %v2015_v29 = vld [vmem:[%s2712_s5 + $0x164] ss:$8 sps:$4 sm:$0xff]  }
 0x1f8   : > { %v914_v38 = vadd.f32 %v913_v19, %v853_v32  ;;  %v857_v39 = vmax.f32 %v820_v33, 0.0  ;;  %v928_v40 = vmul.f32 0.015625, %v899_v34  ;;  %v2013_v31 = vld [vmem:[%s2712_s5 + $0x160] ss:$8 sps:$4 sm:$0xff]   ;;  %v2018_v33 = vld [vmem:[%s2712_s5 + $0x174] ss:$8 sps:$4 sm:$0xff]  }
 0x1f9   : > { %v902_v41 = vadd.f32 %v901_v35, %v856_v36  ;;  %v931_v54 = vpack.c.bf16 %v927_v37, %v927_v37  ;;  %v2016_v35 = vld [vmem:[%s2712_s5 + $0x170] ss:$8 sps:$4 sm:$0xff]   ;;  %v2021_v37 = vld [vmem:[%s2712_s5 + $0x184] ss:$8 sps:$4 sm:$0xff]  }
 0x1fa   : > { %v915_v42 = vadd.f32 %v914_v38, %v857_v39  ;;  %v823_v44 = vpop.f32.mrb[32].mxu0  ;;  %v932_v45 = vpack.c.bf16 %v928_v40, %v928_v40  ;;  %v2019_v39 = vld [vmem:[%s2712_s5 + $0x180] ss:$8 sps:$4 sm:$0xff]  }
 0x1fb   : > { %v824_v50 = vadd.f32 %v823_v44, %v2524_v60  ;;  %v825_v53 = vpop.f32.mrb[33].mxu0 }
 0x1fc   : > { %v826_v56 = vadd.f32 %v825_v53, %v2527_v63  ;;  %v827_v57 = vpop.f32.mrb[34].mxu0  ;;  %1363 = vmatprep.mubr.bf16.mxu1 %v932_v45  ;;  %v2027_v45 = vld [vmem:[%s2712_s5 + $0x1a4] ss:$8 sps:$4 sm:$0xff]   ;;  %v2030_v53 = vld [vmem:[%s2712_s5 + $0x1b4] ss:$8 sps:$4 sm:$0xff]  }
 0x1fd   : > { %v860_v58 = vmax.f32 %v824_v50, 0.0  ;;  %v828_v59 = vadd.f32 %v827_v57, %v2524_v60  ;;  %v829_v61 = vpop.f32.mrb[35].mxu0  ;;  %1364 = vmatmul.mubr.bf16.vlgmr.msra.gmra.mrb[0].mxu1 %v931_v54  ;;  %v2028_v54 = vld [vmem:[%s2712_s5 + $0x1b0] ss:$8 sps:$4 sm:$0xff]   ;;  %v2031_v57 = vld [vmem:[%s2712_s5 + $0x1c0] ss:$8 sps:$4 sm:$0xff]  }
 0x1fe   : > { %v861_v62 = vmax.f32 %v826_v56, 0.0  ;;  %v830_v0 = vadd.f32 %v829_v61, %v2527_v63  ;;  %1373 = vmatpush1.bf16.msra.mxu1 %v1995_v49  ;;  %v2025_v49 = vld [vmem:[%s2712_s5 + $0x1a0] ss:$8 sps:$4 sm:$0xff]   ;;  %v2033_v56 = vld [vmem:[%s2712_s5 + $0x1c4] ss:$8 sps:$4 sm:$0xff]  }
 0x1ff   : > { %v903_v2 = vadd.f32 %v902_v41, %v860_v58  ;;  %v864_v3 = vmax.f32 %v828_v59, 0.0  ;;  %1374 = vmatprep.subr.bf16.mxu1 %v2000_v55  ;;  %v2024_v41 = vld [vmem:[%s2712_s5 + $0x194] ss:$8 sps:$4 sm:$0xff]   ;;  %v2034_v61 = vld [vmem:[%s2712_s5 + $0x1d0] ss:$8 sps:$4 sm:$0xff]  }
 0x200   : > { %v916_v4 = vadd.f32 %v915_v42, %v861_v62  ;;  %v865_v5 = vmax.f32 %v830_v0, 0.0  ;;  %v2022_v42 = vld [vmem:[%s2712_s5 + $0x190] ss:$8 sps:$4 sm:$0xff]   ;;  %v2036_v59 = vld [vmem:[%s2712_s5 + $0x1d4] ss:$8 sps:$4 sm:$0xff]  }
 0x201   : > { %v904_v52 = vadd.f32 %v903_v2, %v864_v3  ;;  %v2039_v0 = vld [vmem:[%s2712_s5 + $0x1e4] ss:$8 sps:$4 sm:$0xff]   ;;  %v2042_v2 = vld [vmem:[%s2712_s5 + $0x1f4] ss:$8 sps:$4 sm:$0xff]  }
 0x202   : > { %v917_v6 = vadd.f32 %v916_v4, %v865_v5  ;;  %1375 = vmatpush1.bf16.msra.mxu1 %v1998_v1  ;;  %v833_v7 = vpop.f32.mrb[36].mxu0  ;;  %v2037_v1 = vld [vmem:[%s2712_s5 + $0x1e0] ss:$8 sps:$4 sm:$0xff]  }
 0x203   : > { %v834_v9 = vadd.f32 %v833_v7, %v2524_v60  ;;  %v835_v10 = vpop.f32.mrb[37].mxu0  ;;  %1376 = vmatprep.subr.bf16.mxu1 %v2003_v51  ;;  %v2040_v51 = vld [vmem:[%s2712_s5 + $0x1f0] ss:$8 sps:$4 sm:$0xff]  }
 0x204   : > { %v836_v47 = vadd.f32 %v835_v10, %v2527_v63  ;;  %v837_v12 = vpop.f32.mrb[38].mxu0  ;;  %v2057_v7 = vld [vmem:[%s2714_s7 + $0x78] sm:$0xff]  }
 0x205   : > { %v868_v13 = vmax.f32 %v834_v9, 0.0  ;;  %v838_v14 = vadd.f32 %v837_v12, %v2524_v60  ;;  %v839_v15 = vpop.f32.mrb[39].mxu0  ;;  %v999_v9 = vld [vmem:[%s2713_s6] sm:$0x3] }
 0x206   : > { %v869_v16 = vmax.f32 %v836_v47, 0.0  ;;  %v840_v17 = vadd.f32 %v839_v15, %v2527_v63  ;;  %1377 = vmatpush1.bf16.msra.mxu1 %v2001_v8  ;;  %v2007_v63 = vld [vmem:[%s2712_s5 + $0x140] ss:$8 sps:$4 sm:$0xff]   ;;  %v2058_v8 = vld [vmem:[%s2714_s7 + $0x38] sm:$0xff]   ;;  %v1324_v10 = vrot.slane %v999_v9, %v518_v46 }
 0x207   : > { %v905_v19 = vadd.f32 %v904_v52, %v868_v13  ;;  %v872_v20 = vmax.f32 %v838_v14, 0.0  ;;  %1378 = vmatprep.subr.bf16.mxu1 %v2006_v11  ;;  %v2055_v52 = vld [vmem:[%s2714_s7 + $0x70] sm:$0xff]   ;;  %v1328_v11 = vrot.slane %v999_v9, %v522_v48  ;;  %v1449_v46 = vld [vmem:[%s2715_s8] sm:$0x1] }
 0x208   : > { %v918_v22 = vadd.f32 %v917_v6, %v869_v16  ;;  %v873_v23 = vmax.f32 %v840_v17, 0.0  ;;  %v2056_v6 = vld [vmem:[%s2714_s7 + $0x30] sm:$0xff]   ;;  %1821 = vmatprep.subr.bf16.mxu0 %v2055_v52 }
 0x209   : > { %v906_v24 = vadd.f32 %v905_v19, %v872_v20  ;;  %1822 = vmatpush3.bf16.msra.mxu0 %v2056_v6 }
 0x20a   : > { %v919_v60 = vadd.f32 %v918_v22, %v873_v23  ;;  %1379 = vmatpush1.bf16.msra.mxu1 %v2004_v18  ;;  %1823 = vmatprep.subr.bf16.mxu0 %v2057_v7 }
 0x20b   : > { %1380 = vmatprep.subr.bf16.mxu1 %v2009_v21  ;;  %v907_v44 = vrot.slane %v906_v24, 4 }
 0x20c   : > { %v920_v26 = vrot.slane %v919_v60, 4 }
 0x20d   : > { %v908_v50 = vadd.f32 %v907_v44, %v906_v24  ;;  %1824 = vmatpush3.bf16.msra.mxu0 %v2058_v8 }
 0x20e   : > { %v921_v27 = vadd.f32 %v920_v26, %v919_v60  ;;  %1381 = vmatpush1.bf16.msra.mxu1 %v2007_v63 }
 0x20f   : > { %1382 = vmatprep.subr.bf16.mxu1 %v2012_v25  ;;  %v909_v55 = vrot.slane %v908_v50, 2 }
 0x210   : > { %v922_v30 = vrot.slane %v921_v27, 2 }
 0x211   : > { %v910_v58 = vadd.f32 %v909_v55, %v908_v50 }
 0x212   : > { %1383 = vmatpush1.bf16.msra.mxu1 %v2010_v28  ;;  %v923_v32 = vadd.f32 %v922_v30, %v921_v27 }
 0x213   : > { %1384 = vmatprep.subr.bf16.mxu1 %v2015_v29  ;;  %v911_v62 = vrot.slane %v910_v58, 1 }
 0x214   : > { %v924_v34 = vrot.slane %v923_v32, 1 }
 0x215   : > { %v912_v3 = vadd.f32 %v911_v62, %v910_v58 }
 0x216   : > { %1385 = vmatpush1.bf16.msra.mxu1 %v2013_v31  ;;  %v925_v36 = vadd.f32 %v924_v34, %v923_v32 }
 0x217   : > { %1386 = vmatprep.subr.bf16.mxu1 %v2018_v33  ;;  %v929_v4 = vmul.f32 0.015625, %v912_v3 }
 0x218   : > { %v930_v38 = vmul.f32 0.015625, %v925_v36 }
 0x219   : > { %v933_v5 = vpack.c.bf16 %v929_v4, %v929_v4 }
 0x21a   : > { %1387 = vmatpush1.bf16.msra.mxu1 %v2016_v35  ;;  %v934_v40 = vpack.c.bf16 %v930_v38, %v930_v38 }
 0x21b   : > { %1388 = vmatprep.subr.bf16.mxu1 %v2021_v37 }
 0x21c   : > { %1404 = vmatprep.mubr.bf16.mxu1 %v934_v40 }
 0x21e   : > { %1389 = vmatpush1.bf16.msra.mxu1 %v2019_v39 }
 0x21f   : > { %1390 = vmatprep.subr.bf16.mxu1 %v2024_v41 }
 0x222   : > { %1391 = vmatpush1.bf16.msra.mxu1 %v2022_v42 }
 0x223   : > { %1392 = vmatprep.subr.bf16.mxu1 %v2027_v45 }
 0x226   : > { %1393 = vmatpush1.bf16.msra.mxu1 %v2025_v49 }
 0x227   : > { %1394 = vmatprep.subr.bf16.mxu1 %v2030_v53 }
 0x22a   : > { %1395 = vmatpush1.bf16.msra.mxu1 %v2028_v54 }
 0x22b   : > { %1396 = vmatprep.subr.bf16.mxu1 %v2033_v56 }
 0x22e   : > { %1397 = vmatpush1.bf16.msra.mxu1 %v2031_v57 }
 0x22f   : > { %1398 = vmatprep.subr.bf16.mxu1 %v2036_v59 }
 0x232   : > { %1399 = vmatpush1.bf16.msra.mxu1 %v2034_v61 }
 0x233   : > { %1400 = vmatprep.subr.bf16.mxu1 %v2039_v0 }
 0x236   : > { %1401 = vmatpush1.bf16.msra.mxu1 %v2037_v1 }
 0x237   : > { %1402 = vmatprep.subr.bf16.mxu1 %v2042_v2 }
 0x23a   : > { %1403 = vmatpush1.bf16.msra.mxu1 %v2040_v51 }
 0x23d   : > { %1405 = vmatmul.mubr.bf16.vlgmr.msra.gmra.mrb[0].mxu1 %v933_v5 }
 0x310   : > { %v1406_v47 = vpop.f32.mrb[0].mxu1 }
 0x311   : > { %v1845_v12 = vadd.f32 %v1406_v47, %v1324_v10  ;;  %v1408_v13 = vpop.f32.mrb[1].mxu1 }
 0x312   : > { %v1846_v14 = vadd.f32 %v1408_v13, %v1328_v11  ;;  %v1410_v15 = vpop.f32.mrb[2].mxu1 }
 0x313   : > { %v1413_v16 = vmax.f32 %v1845_v12, 0.0  ;;  %v1411_v17 = vpop.f32.mrb[3].mxu1 }
 0x314   : > { %v1414_v18 = vmax.f32 %v1846_v14, 0.0 }
 0x315   : > { %v1415_v20 = vpack.c.bf16 %v1413_v16, %v1413_v16 }
 0x316   : > { %v1416_v19 = vpack.c.bf16 %v1414_v18, %v1414_v18 }
 0x318   : > { %1578 = vmatprep.mubr.bf16.mxu0 %v1416_v19 }
 0x319   : > { %1579 = vmatmul.mubr.bf16.vlgmr.msra.gmra.mrb[40].mxu0 %v1415_v20 }
 0x3ec   : > { %v1825_v21 = vpop.f32.mrb[40].mxu0 }
 0x3ed   : > { %v1826_v22 = vpop.f32.mrb[41].mxu0 }
 0x3ee   : > { %v1827_v43 = vadd.f32 %v1826_v22, %v1825_v21  ;;  %v1828_v48 = vpop.f32.mrb[42].mxu0 }
 0x3ef   : > { %v1829_v23 = vpop.f32.mrb[43].mxu0 }
 0x3f0   : > { %v1581_v24 = vadd.f32 %v1827_v43, %v1449_v46 }
 0x3f2   : > { %v1587_v60 = vsel %vm1586_vm2, %v1581_v24, -inf }
 0x3f3   : > { %1588 = vmax.xlane.f32.xlu0 %v1587_v60 }
 0x480   : > { %v1589_v63 = vpop.xlane.xlu0 %1588 }
 0x481   : > { %v1590_v25 = vsub.f32 %v1581_v24, %v1589_v63 }
 0x483   : > { %v1591_v26 = vmul.f32 1.442695, %v1590_v25 }
 0x485   : > { %2059 = vpow2.f32 %v1591_v26 }
 0x48f   : > { %v2060_v27 = vpop.eup %2059 }
 0x490   : > { %v1593_v28 = vsel %vm1586_vm2, %v2060_v27, 0.0 }
 0x491   : > { %1594 = vadd.xlane.f32.xlu0 %v1593_v28 }
 0x51e   : > { %v1595_v29 = vpop.xlane.xlu0 %1594 }
 0x51f   : > { %2061 = vlog2.f32 %v1595_v29 }
 0x529   : > { %v2062_v30 = vpop.eup %2061 }
 0x52a   : > { %v1597_v31 = vmul.f32 0.6931472, %v2062_v30 }
 0x52c   : > { %v1598_v32 = vadd.f32 %v1597_v31, %v1589_v63 }
 0x52e   : > { %v1599_v33 = vsub.f32 %v1581_v24, %v1598_v32 }
 0x530   : > { %1600 = vst [vmem:[%s325_s16] sm:$0x1] %v1599_v33 }
 0x531   : > { %2076 = shalt.err (!%p2073_p3)
}
 0x532   : > { %s2077_s24 = scalar_lea.hbm %s2665_s14, 16  ;;  %s2081_s16 = scalar_lea.hbm %s2716_s9, 32 }
 0x533   : > { %p2078_p4 = scmp.ne.s32.totalorder %s2665_s14, %s2077_s24  ;;  %p2082_p9 = scmp.lt.u32.totalorder %s2665_s14, %s2716_s9 }
 0x534   : > { %p2083_p10 = scmp.lt.u32.totalorder %s2081_s16, %s2077_s24  ;;  %p2085_p12 = scmp.lt.u32.totalorder %s2077_s24, %s2665_s14 }
 0x535   : > { %p2079_p7 = pnand %p2078_p4, %p2217_p5 }
 0x536   : > { %p2084_p11 = por %p2083_p10, %p2082_p9 }
 0x537   : > { %p2080_p8 = pneg %p2079_p7 }
 0x538   : > { %p2086_p13 = por %p2085_p12, %p2084_p11 }
 0x53a   : > { %p2087_p0 = pnand %p2086_p13, %p2080_p8 }
 0x53c   : > { %2090 = shalt.err (!%p2087_p0)
}
 0x53d   : > { %1852 = dma.vmem_to_hbm [thread:$0]  (%p2217_p5), %s2667_s27, 16, %s2665_s14, %s1602_s17  }
 0x53e PF: > { %p1858_p1 = scmp.ge.s32.totalorder %s2125_s12, 2  ;;  %s1626_s21 = sand.u32 1, %s2113_s30  }
 0x53f   : > { %s1627_s13 = scalar_lea.sflag [#allocation3], %s1626_s21 }
 0x540   : > { %p1855_p2 = pnand %p1858_p1, %p2221_p6 }
 0x542   : > { %2108 = dma.done.wait (!%p1855_p2), %s1627_s13, 16  }
 0x543   : > { %2110 = vsyncadd (!%p1855_p2), %s1627_s13, 4294967280  ;;  %p19_p3 = scmp.ge.s32.totalorder %s2204_s15, 4   ;;  %s2719_s30 = smov %s2117_s10 }
 0x544   : > { %s2720_s10 = smov %s2121_s11  ;;  %s2721_s11 = smov %s2215_s18 }
 0x545   : > { %s2722_s12 = smov %s2204_s15  ;;  %21 = sbr.rel (!%p19_p3) target bundleno = 3 (0x3), region = 91 }
 0x54c   :  { %1631 = vsyncpa [#allocation3], 1 }
 0x54d   :  { %1633 = vsyncpa [#allocation3 + $0x1], 1 }

</bundles_post_ra>
